<compile_context>
chip_gen: v7x
topology: tpu7x:2x2x1
jax: 0.10.0
libtpu: 0.0.40
codegen_flags: <defaults>
</compile_context>

<pallas_src>
import math

import numpy as np
import jax
import jax.numpy as jnp
from jax.experimental import pallas as pl
from jax.experimental.pallas import tpu as pltpu


def _self_attention_kernel(x_ref, mask_ref, wqkv_ref, bqkv_ref, wo_ref, bo_ref,
                           o_ref, acc_ref):
    # Grid: (batch blocks [parallel], heads [arbitrary, innermost]).
    # x_ref:    (bt, L, D)  bf16   (resident across the head axis)
    # mask_ref: (bt, 1, L)  f32    additive key mask (0 or -1e30)
    # wqkv_ref: (1, D, 3*hd) bf16  head-h fused [Wq*scale | Wk | Wv]
    # bqkv_ref: (1, 1, 3*hd) f32   head-h fused [bq*scale | bk | bv]
    # wo_ref:   (1, hd, D)  bf16   head-h rows of Wo
    # bo_ref:   (1, D)      f32
    # acc_ref:  (bt*L, D)   f32    output-projection accumulator (scratch, persists over heads)
    Bt, L, D = x_ref.shape
    hd = wo_ref.shape[1]
    h = pl.program_id(1)

    # Head h's fused [q|k|v] projection; softmax scale is pre-folded into the Q columns.
    x2 = x_ref[...].reshape(Bt * L, D)                                        # free leading-dim merge
    qkv = jnp.dot(x2, wqkv_ref[0], preferred_element_type=jnp.float32) + bqkv_ref[0]   # (Bt*L, 3hd) f32
    q = qkv[:, 0 * hd:1 * hd].reshape(Bt, L, hd).astype(jnp.bfloat16)
    k = qkv[:, 1 * hd:2 * hd].reshape(Bt, L, hd).astype(jnp.bfloat16)
    v = qkv[:, 2 * hd:3 * hd].reshape(Bt, L, hd).astype(jnp.bfloat16)

    # Scores for this head, batched over batch rows (single-batch-dim einsum,
    # contraction on the trailing head_dim: no K transpose).
    s = jnp.einsum('bqd,bkd->bqk', q, k, preferred_element_type=jnp.float32)  # (Bt, L, L) f32
    s = s + mask_ref[...]                                                     # broadcast over queries
    s = s - jnp.max(s, axis=-1, keepdims=True)
    p = jnp.exp(s)                                                            # softmax strictly f32
    p = p * pl.reciprocal(jnp.sum(p, axis=-1, keepdims=True), approx=True)

    o = jnp.einsum('bqk,bkd->bqd', p.astype(jnp.bfloat16), v,
                   preferred_element_type=jnp.float32)                        # (Bt, L, hd) f32

    # Fused output projection: this head's contribution to y = concat_h(o_h) @ Wo + bo.
    contrib = jnp.dot(o.reshape(Bt * L, hd).astype(jnp.bfloat16), wo_ref[0],
                      preferred_element_type=jnp.float32)                     # (Bt*L, D) f32

    @pl.when(h == 0)
    def _():
        acc_ref[...] = contrib + bo_ref[...]

    @pl.when(h != 0)
    def _():
        acc_ref[...] = acc_ref[...] + contrib

    @pl.when(h == pl.num_programs(1) - 1)
    def _():
        o_ref[...] = acc_ref[...].reshape(o_ref.shape).astype(o_ref.dtype)


def _vmem_limit_bytes():
    """~3/4 of physical VMEM: ~96 MiB on v5e/v6e (128 MiB), ~48 MiB on v7x (64 MiB)."""
    cap = 128 * 1024 * 1024
    try:
        info = pltpu.get_tpu_info()
        cap = int(getattr(info, "vmem_capacity_bytes", cap) or cap)
    except Exception:
        pass
    return (cap * 3) // 4


def _pick_batch_block(B, L, D, vmem_limit_bytes):
    """Largest batch block whose per-grid-step footprint fits the VMEM budget.

    Per batch row, per head step (only one head is live at a time):
      ~8*L*L bytes for the f32 score + bf16 prob + exp temps, and
      ~32*L*D bytes for x / out / acc / qkv / q,k,v / contrib (incl. double buffering).
    Half the scoped limit is left for the pipeline's double-buffered blocks and
    compiler scratch.  (For MXU fill, prefer bt*L >= 256 on v6e/v7x when B allows.)
    """
    per_row = 8 * L * L + 32 * L * D
    budget = max(vmem_limit_bytes // 2, per_row)
    bt = max(1, min(B, budget // per_row))
    if B >= 2:
        bt = min(bt, B // 2)   # keep >=2 parallel grid steps so both v7x TensorCores get work
    while B % bt:              # grid must tile B exactly
        bt -= 1
    return bt


def prepare_params(params, nhead):
    """One-time (parameter-load-time) weight prep: fold the softmax scale into Wq/bq,
    fuse [Wq|Wk|Wv] per head (head-major), and cast MXU operands to bf16."""
    wq, wk, wv, bq, bk, bv, wo, bo = params
    D = wq.shape[0]
    assert D % nhead == 0
    hd = D // nhead
    scale = 1.0 / math.sqrt(hd)

    wqh = (wq * scale).reshape(D, nhead, hd)
    wkh = wk.reshape(D, nhead, hd)
    wvh = wv.reshape(D, nhead, hd)
    wqkv = jnp.concatenate([wqh, wkh, wvh], axis=-1)                # (D, H, 3*hd)
    wqkv = jnp.transpose(wqkv, (1, 0, 2)).astype(jnp.bfloat16)      # (H, D, 3*hd)

    bqh = (bq * scale).reshape(nhead, hd)
    bkh = bk.reshape(nhead, hd)
    bvh = bv.reshape(nhead, hd)
    bqkv = jnp.concatenate([bqh, bkh, bvh], axis=-1)                # (H, 3*hd)
    bqkv = bqkv.reshape(nhead, 1, 3 * hd).astype(jnp.float32)

    wo_h = wo.reshape(nhead, hd, D).astype(jnp.bfloat16)            # head-h rows of Wo
    bo2 = bo.reshape(1, D).astype(jnp.float32)
    return (wqkv, bqkv, wo_h, bo2)


def self_attention_block(x, prepared, key_padding_mask=None, batch_block=None):
    """x: (B, L, D) f32.  key_padding_mask: (B, L) bool, True = ignore key
       (the `inverted_binary_mask` that nn.MultiheadAttention receives)."""
    wqkv, bqkv, wo_h, bo2 = prepared
    B, L, D = x.shape
    H = wqkv.shape[0]
    hd = D // H
    assert H * hd == D

    vmem_limit = _vmem_limit_bytes()
    bt = batch_block if batch_block is not None else _pick_batch_block(B, L, D, vmem_limit)
    assert B % bt == 0

    x_bf = x.astype(jnp.bfloat16)
    if key_padding_mask is None:
        add_mask = jnp.zeros((B, 1, L), dtype=jnp.float32)
    else:
        # Large finite negative instead of -inf: avoids NaN for fully-padded rows.
        add_mask = jnp.where(key_padding_mask, -1e30, 0.0).astype(jnp.float32)[:, None, :]

    # Lane-dense output layout for small D: when D < 128 the (bt, L, D) out block stores via
    # masked partial stores; flatten to (B, L*D) when the batch block is sublane-aligned.
    flat = (D % 128 != 0) and ((L * D) % 128 == 0) and (bt % 8 == 0)
    if flat:
        out_struct = jax.ShapeDtypeStruct((B, L * D), x.dtype)
        out_spec = pl.BlockSpec((bt, L * D), lambda i, h: (i, 0))
    else:
        out_struct = jax.ShapeDtypeStruct((B, L, D), x.dtype)
        out_spec = pl.BlockSpec((bt, L, D), lambda i, h: (i, 0, 0))

    grid = (B // bt, H)   # batch blocks (parallel) x heads (arbitrary reduction, last)

    cost = pl.CostEstimate(
        flops=int(8 * B * L * D * D + 4 * B * L * L * D),
        transcendentals=int(B * H * L * L),
        bytes_accessed=int(6 * B * L * D + 4 * B * L + 8 * D * D),
    )

    out = pl.pallas_call(
        _self_attention_kernel,
        out_shape=out_struct,
        grid_spec=pltpu.PrefetchScalarGridSpec(
            num_scalar_prefetch=0,
            grid=grid,
            in_specs=[
                pl.BlockSpec((bt, L, D), lambda i, h: (i, 0, 0)),      # x (bf16), resident across heads
                pl.BlockSpec((bt, 1, L), lambda i, h: (i, 0, 0)),      # additive key mask (f32)
                pl.BlockSpec((1, D, 3 * hd), lambda i, h: (h, 0, 0)),  # head-h fused [Wq|Wk|Wv] (bf16)
                pl.BlockSpec((1, 1, 3 * hd), lambda i, h: (h, 0, 0)),  # head-h fused bias (f32)
                pl.BlockSpec((1, hd, D), lambda i, h: (h, 0, 0)),      # head-h rows of Wo (bf16)
                pl.BlockSpec((1, D), lambda i, h: (0, 0)),             # bo (f32)
            ],
            out_specs=out_spec,
            scratch_shapes=[pltpu.VMEM((bt * L, D), jnp.float32)],     # output-projection accumulator
        ),
        compiler_params=pltpu.CompilerParams(
            dimension_semantics=("parallel", "arbitrary"),
            vmem_limit_bytes=vmem_limit,
        ),
        cost_estimate=cost,
    )(x_bf, add_mask, wqkv, bqkv, wo_h, bo2)

    if flat:
        out = out.reshape(B, L, D)
    # TODO(synk): nn.Dropout(p=0.1) after attention is identity here (eval-mode semantics).
    return out


def _reference(x, params, nhead, key_padding_mask=None):
    """Pure-JAX f32 reference mirroring torch.nn.MultiheadAttention forward."""
    B, L, D = x.shape
    wq, wk, wv, bq, bk, bv, wo, bo = params
    hd = D // nhead
    q = x @ wq + bq
    k = x @ wk + bk
    v = x @ wv + bv
    q = q.reshape(B, L, nhead, hd).transpose(0, 2, 1, 3)
    k = k.reshape(B, L, nhead, hd).transpose(0, 2, 1, 3)
    v = v.reshape(B, L, nhead, hd).transpose(0, 2, 1, 3)
    s = jnp.einsum("bhqd,bhkd->bhqk", q, k) / math.sqrt(hd)
    if key_padding_mask is not None:
        s = s + jnp.where(key_padding_mask, -jnp.inf, 0.0)[:, None, None, :]
    p = jax.nn.softmax(s, axis=-1)
    o = jnp.einsum("bhqk,bhkd->bhqd", p, v)
    o = o.transpose(0, 2, 1, 3).reshape(B, L, D)
    return o @ wo + bo


if __name__ == "__main__":
    B, L, D, H = 2, 8, 32, 4
    key = jax.random.PRNGKey(0)
    kx, kw, kb, kwo, kbo = jax.random.split(key, 5)

    x = jax.random.normal(kx, (B, L, D), dtype=jnp.float32)

    # nn.MultiheadAttention params: in_proj_weight (3D, D), in_proj_bias (3D,),
    # out_proj.weight (D, D), out_proj.bias (D,).  Pre-transposed for the x @ W form.
    in_proj_w = 0.1 * jax.random.normal(kw, (3 * D, D), dtype=jnp.float32)
    in_proj_b = 0.1 * jax.random.normal(kb, (3 * D,), dtype=jnp.float32)
    out_proj_w = 0.1 * jax.random.normal(kwo, (D, D), dtype=jnp.float32)
    out_proj_b = 0.1 * jax.random.normal(kbo, (D,), dtype=jnp.float32)

    wq = in_proj_w[0 * D:1 * D].T
    wk = in_proj_w[1 * D:2 * D].T
    wv = in_proj_w[2 * D:3 * D].T
    bq = in_proj_b[0 * D:1 * D]
    bk = in_proj_b[1 * D:2 * D]
    bv = in_proj_b[2 * D:3 * D]
    wo = out_proj_w.T
    bo = out_proj_b
    params = (wq, wk, wv, bq, bk, bv, wo, bo)

    prepared = prepare_params(params, H)   # one-time, parameter-load-time prep

    # key_padding_mask (inverted binary mask): True = padded/ignored key position.
    key_padding_mask = jnp.zeros((B, L), dtype=bool).at[1, -2:].set(True)

    out = jax.block_until_ready(self_attention_block(x, prepared, key_padding_mask))
    ref = _reference(x, params, H, key_padding_mask)
    # bf16 matmul inputs + approx reciprocal vs f32 reference -> relaxed tolerance.
    np.testing.assert_allclose(np.asarray(out), np.asarray(ref), rtol=5e-2, atol=5e-2)

    # Also exercise the mask=None path.
    out_nomask = jax.block_until_ready(self_attention_block(x, prepared, None))
    ref_nomask = _reference(x, params, H, None)
    np.testing.assert_allclose(np.asarray(out_nomask), np.asarray(ref_nomask),
                               rtol=5e-2, atol=5e-2)

    print("KERNEL_OK")
</pallas_src>

<mosaic_0001>
module attributes {stable_mosaic.version = 11 : i64} {
  func.func @_self_attention_kernel(%arg0: i32, %arg1: i32, %arg2: memref<1x8x32xbf16, #tpu.memory_space<vmem>>, %arg3: memref<1x1x8xf32, #tpu.memory_space<vmem>>, %arg4: memref<1x32x24xbf16, #tpu.memory_space<vmem>>, %arg5: memref<1x1x24xf32, #tpu.memory_space<vmem>>, %arg6: memref<1x8x32xbf16, #tpu.memory_space<vmem>>, %arg7: memref<1x32xf32, #tpu.memory_space<vmem>>, %arg8: memref<1x8x32xf32, #tpu.memory_space<vmem>>, %arg9: memref<8x32xf32, #tpu.memory_space<vmem>>) attributes {dimension_semantics = [#tpu.dimension_semantics<parallel>, #tpu.dimension_semantics<arbitrary>], iteration_bounds = array<i64: 2, 4>, scalar_prefetch = 0 : i64, scratch_operands = 1 : i64, tpu.core_type = #tpu.core_type<tc>, window_params = [{transform_indices = @transform_0, window_bounds = array<i64: 1, 8, 32>}, {transform_indices = @transform_1, window_bounds = array<i64: 1, 1, 8>}, {transform_indices = @transform_2, window_bounds = array<i64: 1, 32, 24>}, {transform_indices = @transform_3, window_bounds = array<i64: 1, 1, 24>}, {transform_indices = @transform_4, window_bounds = array<i64: 1, 8, 32>}, {pipeline_mode = #tpu.pipeline_mode<synchronous>, transform_indices = @transform_5, window_bounds = array<i64: 1, 32>}, {transform_indices = @transform_6, window_bounds = array<i64: 1, 8, 32>}]} {
    %c0 = arith.constant 0 : index
    %c0_0 = arith.constant 0 : index
    %c0_1 = arith.constant 0 : index
    %0 = vector.load %arg2[%c0, %c0_0, %c0_1] : memref<1x8x32xbf16, #tpu.memory_space<vmem>>, vector<1x8x32xbf16>
    %1 = vector.shape_cast %0 : vector<1x8x32xbf16> to vector<8x32xbf16>
    %c0_2 = arith.constant 0 : index
    %c0_3 = arith.constant 0 : index
    %c0_4 = arith.constant 0 : index
    %2 = vector.load %arg4[%c0_2, %c0_3, %c0_4] : memref<1x32x24xbf16, #tpu.memory_space<vmem>>, vector<1x32x24xbf16>
    %3 = vector.shape_cast %2 : vector<1x32x24xbf16> to vector<32x24xbf16>
    %cst = arith.constant dense<0.000000e+00> : vector<8x24xf32>
    %4 = tpu.matmul %1, %3, %cst {dimension_numbers = #tpu.dot_dimension_numbers<[1], [0], [0], [1], [0, 0, 1, 1], [], []>} : vector<8x32xbf16>, vector<32x24xbf16>, vector<8x24xf32> -> vector<8x24xf32>
    %c0_5 = arith.constant 0 : index
    %c0_6 = arith.constant 0 : index
    %c0_7 = arith.constant 0 : index
    %5 = vector.load %arg5[%c0_5, %c0_6, %c0_7] : memref<1x1x24xf32, #tpu.memory_space<vmem>>, vector<1x1x24xf32>
    %6 = vector.shape_cast %5 : vector<1x1x24xf32> to vector<1x24xf32>
    %7 = vector.broadcast %6 : vector<1x24xf32> to vector<8x24xf32>
    %8 = arith.addf %4, %7 : vector<8x24xf32>
    %9 = vector.extract_strided_slice %8 {offsets = [0, 0], sizes = [8, 8], strides = [1, 1]} : vector<8x24xf32> to vector<8x8xf32>
    %10 = vector.shape_cast %9 : vector<8x8xf32> to vector<1x8x8xf32>
    %11 = arith.truncf %10 : vector<1x8x8xf32> to vector<1x8x8xbf16>
    %12 = vector.extract_strided_slice %8 {offsets = [0, 8], sizes = [8, 8], strides = [1, 1]} : vector<8x24xf32> to vector<8x8xf32>
    %13 = vector.shape_cast %12 : vector<8x8xf32> to vector<1x8x8xf32>
    %14 = arith.truncf %13 : vector<1x8x8xf32> to vector<1x8x8xbf16>
    %15 = vector.extract_strided_slice %8 {offsets = [0, 16], sizes = [8, 8], strides = [1, 1]} : vector<8x24xf32> to vector<8x8xf32>
    %16 = vector.shape_cast %15 : vector<8x8xf32> to vector<1x8x8xf32>
    %17 = arith.truncf %16 : vector<1x8x8xf32> to vector<1x8x8xbf16>
    "tpu.trace_start"() <{level = 10 : i32, message = "bqd,bkd->bqk"}> : () -> ()
    %cst_8 = arith.constant dense<0.000000e+00> : vector<1x8x8xf32>
    %18 = tpu.matmul %11, %14, %cst_8 {dimension_numbers = #tpu.dot_dimension_numbers<[2], [2], [1], [1], [0, 0, 0, 1, 1, 1], [0], [0]>} : vector<1x8x8xbf16>, vector<1x8x8xbf16>, vector<1x8x8xf32> -> vector<1x8x8xf32>
    "tpu.trace_stop"() : () -> ()
    %c0_9 = arith.constant 0 : index
    %c0_10 = arith.constant 0 : index
    %c0_11 = arith.constant 0 : index
    %19 = vector.load %arg3[%c0_9, %c0_10, %c0_11] : memref<1x1x8xf32, #tpu.memory_space<vmem>>, vector<1x1x8xf32>
    %20 = vector.broadcast %19 : vector<1x1x8xf32> to vector<1x8x8xf32>
    %21 = arith.addf %18, %20 : vector<1x8x8xf32>
    %cst_12 = arith.constant dense<0xFF800000> : vector<1x8xf32>
    %22 = vector.multi_reduction <maximumf>, %21, %cst_12 [2] : vector<1x8x8xf32> to vector<1x8xf32>
    %23 = vector.shape_cast %22 : vector<1x8xf32> to vector<1x8x1xf32>
    %24 = vector.broadcast %23 : vector<1x8x1xf32> to vector<1x8x8xf32>
    %25 = arith.subf %21, %24 : vector<1x8x8xf32>
    %26 = math.exp %25 : vector<1x8x8xf32>
    %cst_13 = arith.constant dense<0.000000e+00> : vector<1x8xf32>
    %27 = vector.multi_reduction <add>, %26, %cst_13 [2] : vector<1x8x8xf32> to vector<1x8xf32>
    %28 = vector.shape_cast %27 : vector<1x8xf32> to vector<1x8x1xf32>
    %29 = tpu.reciprocal %28 {approx = true} : vector<1x8x1xf32> -> vector<1x8x1xf32>
    %30 = vector.broadcast %29 : vector<1x8x1xf32> to vector<1x8x8xf32>
    %31 = arith.mulf %26, %30 : vector<1x8x8xf32>
    %32 = arith.truncf %31 : vector<1x8x8xf32> to vector<1x8x8xbf16>
    "tpu.trace_start"() <{level = 10 : i32, message = "bqk,bkd->bqd"}> : () -> ()
    %cst_14 = arith.constant dense<0.000000e+00> : vector<1x8x8xf32>
    %33 = tpu.matmul %32, %17, %cst_14 {dimension_numbers = #tpu.dot_dimension_numbers<[2], [1], [1], [2], [0, 0, 0, 1, 1, 2], [0], [0]>} : vector<1x8x8xbf16>, vector<1x8x8xbf16>, vector<1x8x8xf32> -> vector<1x8x8xf32>
    "tpu.trace_stop"() : () -> ()
    %34 = vector.shape_cast %33 : vector<1x8x8xf32> to vector<8x8xf32>
    %35 = arith.truncf %34 : vector<8x8xf32> to vector<8x8xbf16>
    %c0_15 = arith.constant 0 : index
    %c0_16 = arith.constant 0 : index
    %c0_17 = arith.constant 0 : index
    %36 = vector.load %arg6[%c0_15, %c0_16, %c0_17] : memref<1x8x32xbf16, #tpu.memory_space<vmem>>, vector<1x8x32xbf16>
    %37 = vector.shape_cast %36 : vector<1x8x32xbf16> to vector<8x32xbf16>
    %cst_18 = arith.constant dense<0.000000e+00> : vector<8x32xf32>
    %38 = tpu.matmul %35, %37, %cst_18 {dimension_numbers = #tpu.dot_dimension_numbers<[1], [0], [0], [1], [0, 0, 1, 1], [], []>} : vector<8x8xbf16>, vector<8x32xbf16>, vector<8x32xf32> -> vector<8x32xf32>
    %c0_i32 = arith.constant 0 : i32
    %39 = arith.cmpi eq, %arg1, %c0_i32 : i32
    %40 = arith.extui %39 : i1 to i32
    %c0_i32_19 = arith.constant 0 : i32
    %41 = arith.cmpi ne, %40, %c0_i32_19 : i32
    scf.if %41 {
      %c0_23 = arith.constant 0 : index
      %c0_24 = arith.constant 0 : index
      %48 = vector.load %arg7[%c0_23, %c0_24] : memref<1x32xf32, #tpu.memory_space<vmem>>, vector<1x32xf32>
      %49 = vector.broadcast %48 : vector<1x32xf32> to vector<8x32xf32>
      %50 = arith.addf %38, %49 : vector<8x32xf32>
      %c0_25 = arith.constant 0 : index
      %c0_26 = arith.constant 0 : index
      %51 = vector.load %arg9[%c0_25, %c0_26] : memref<8x32xf32, #tpu.memory_space<vmem>>, vector<8x32xf32>
      tpu.vector_store %arg9[%c0_25, %c0_26], %50 {strides = array<i32>} : memref<8x32xf32, #tpu.memory_space<vmem>>, vector<8x32xf32>,
    } else {
    }
    %c0_i32_20 = arith.constant 0 : i32
    %42 = arith.cmpi ne, %arg1, %c0_i32_20 : i32
    %43 = arith.extui %42 : i1 to i32
    %c0_i32_21 = arith.constant 0 : i32
    %44 = arith.cmpi ne, %43, %c0_i32_21 : i32
    scf.if %44 {
      %c0_23 = arith.constant 0 : index
      %c0_24 = arith.constant 0 : index
      %48 = vector.load %arg9[%c0_23, %c0_24] : memref<8x32xf32, #tpu.memory_space<vmem>>, vector<8x32xf32>
      %49 = arith.addf %48, %38 : vector<8x32xf32>
      %c0_25 = arith.constant 0 : index
      %c0_26 = arith.constant 0 : index
      %50 = vector.load %arg9[%c0_25, %c0_26] : memref<8x32xf32, #tpu.memory_space<vmem>>, vector<8x32xf32>
      tpu.vector_store %arg9[%c0_25, %c0_26], %49 {strides = array<i32>} : memref<8x32xf32, #tpu.memory_space<vmem>>, vector<8x32xf32>,
    } else {
    }
    %c3_i32 = arith.constant 3 : i32
    %45 = arith.cmpi eq, %arg1, %c3_i32 : i32
    %46 = arith.extui %45 : i1 to i32
    %c0_i32_22 = arith.constant 0 : i32
    %47 = arith.cmpi ne, %46, %c0_i32_22 : i32
    scf.if %47 {
      %c0_23 = arith.constant 0 : index
      %c0_24 = arith.constant 0 : index
      %48 = vector.load %arg9[%c0_23, %c0_24] : memref<8x32xf32, #tpu.memory_space<vmem>>, vector<8x32xf32>
      %49 = vector.shape_cast %48 : vector<8x32xf32> to vector<1x8x32xf32>
      %c0_25 = arith.constant 0 : index
      %c0_26 = arith.constant 0 : index
      %c0_27 = arith.constant 0 : index
      %50 = vector.load %arg8[%c0_25, %c0_26, %c0_27] : memref<1x8x32xf32, #tpu.memory_space<vmem>>, vector<1x8x32xf32>
      tpu.vector_store %arg8[%c0_25, %c0_26, %c0_27], %49 {strides = array<i32>} : memref<1x8x32xf32, #tpu.memory_space<vmem>>, vector<1x8x32xf32>,
    } else {
    }
    return
  }
  func.func @transform_0(%arg0: i32, %arg1: i32) -> (i32, i32, i32) {
    %c0_i32 = arith.constant 0 : i32
    %c0_i32_0 = arith.constant 0 : i32
    %c0_i32_1 = arith.constant 0 : i32
    return %arg0, %c0_i32, %c0_i32_0 : i32, i32, i32
  }
  func.func @transform_1(%arg0: i32, %arg1: i32) -> (i32, i32, i32) {
    %c0_i32 = arith.constant 0 : i32
    %c0_i32_0 = arith.constant 0 : i32
    %c0_i32_1 = arith.constant 0 : i32
    return %arg0, %c0_i32, %c0_i32_0 : i32, i32, i32
  }
  func.func @transform_2(%arg0: i32, %arg1: i32) -> (i32, i32, i32) {
    %c0_i32 = arith.constant 0 : i32
    %c0_i32_0 = arith.constant 0 : i32
    %c0_i32_1 = arith.constant 0 : i32
    return %arg1, %c0_i32, %c0_i32_0 : i32, i32, i32
  }
  func.func @transform_3(%arg0: i32, %arg1: i32) -> (i32, i32, i32) {
    %c0_i32 = arith.constant 0 : i32
    %c0_i32_0 = arith.constant 0 : i32
    %c0_i32_1 = arith.constant 0 : i32
    return %arg1, %c0_i32, %c0_i32_0 : i32, i32, i32
  }
  func.func @transform_4(%arg0: i32, %arg1: i32) -> (i32, i32, i32) {
    %c0_i32 = arith.constant 0 : i32
    %c0_i32_0 = arith.constant 0 : i32
    %c0_i32_1 = arith.constant 0 : i32
    return %arg1, %c0_i32, %c0_i32_0 : i32, i32, i32
  }
  func.func @transform_5(%arg0: i32, %arg1: i32) -> (i32, i32) {
    %c0_i32 = arith.constant 0 : i32
    %c0_i32_0 = arith.constant 0 : i32
    %c0_i32_1 = arith.constant 0 : i32
    return %c0_i32, %c0_i32_0 : i32, i32
  }
  func.func @transform_6(%arg0: i32, %arg1: i32) -> (i32, i32, i32) {
    %c0_i32 = arith.constant 0 : i32
    %c0_i32_0 = arith.constant 0 : i32
    %c0_i32_1 = arith.constant 0 : i32
    return %arg0, %c0_i32, %c0_i32_0 : i32, i32, i32
  }
}

</mosaic_0001>

<bundles_post_ra>
// kernel: tpu_custom_call.1
= control target key start
LH: loop header
LB: loop body
LE: loop exit
PB: predicated region body
PF: predicated region fallthrough
CT: control target
= control target key end

     0   :  { %s1935_s0 = inlined_call_operand.hbm [shape: bf16[2,8,32], index: 0, kind: input, shape index: {}]   ;;  %s1936_s1 = inlined_call_operand.hbm [shape: f32[2,1,8], index: 1, kind: input, shape index: {}]   ;;  %s1937_s2 = inlined_call_operand.hbm [shape: bf16[4,32,24], index: 2, kind: input, shape index: {}]   ;;  %s1938_s3 = inlined_call_operand.hbm [shape: f32[4,1,24], index: 3, kind: input, shape index: {}]   ;;  %s1939_s4 = inlined_call_operand.hbm [shape: bf16[4,8,32], index: 4, kind: input, shape index: {}]   ;;  %s1940_s5 = inlined_call_operand.hbm [shape: f32[1,32], index: 5, kind: input, shape index: {}]   ;;  %s1941_s6 = inlined_call_operand.hbm [shape: f32[2,8,32], index: 6, kind: output, shape index: {}]  }
   0x1   :  { %1973 = sst [smem:[#allocation37_spill]] %s1936_s1 }
   0x2   :  { %1974 = sst [smem:[#allocation38_spill]] %s1938_s3 }
   0x3   :  { %1975 = sst [smem:[#allocation39_spill]] %s1939_s4 }
   0x4   :  { %1976 = sst [smem:[#allocation40_spill]] %s1941_s6 }
   0x5   :  { %11 = vsyncpa [#allocation4], 0 }
   0x6   :  { %13 = vsyncpa [#allocation4 + $0x1], 0 }
   0x7   :  { %14 = vsyncpa [#allocation7], 0 }
   0x8   :  { %16 = vsyncpa [#allocation7 + $0x1], 0 }
   0x9   :  { %17 = vsyncpa [#allocation10], 0 }
   0xa   :  { %19 = vsyncpa [#allocation10 + $0x1], 0 }
   0xb   :  { %20 = vsyncpa [#allocation13], 0 }
   0xc   :  { %21 = vsyncpa [#allocation5], 0 }
   0xd   :  { %23 = vsyncpa [#allocation5 + $0x1], 0  ;;  %s1461_s21 = smov 0   ;;  %s1463_s22 = smov 0  }
   0xe   :  { %s1465_s23 = smov 0   ;;  %s1467_s24 = smov 0  }
   0xf   :  { %s1469_s25 = smov 0   ;;  %s1471_s26 = smov 0  }
  0x10   :  { %s1473_s27 = smov 0   ;;  %s1475_s28 = smov 0  }
  0x11   :  { %s1477_s29 = smov 0   ;;  %s1479_s30 = smov 0  }
  0x12   :  { %s1481_s7 = smov 0  }
  0x13 LB: > { %1977 = sst [smem:[#allocation21_spill]] %s1379_s23  ;;  %s41_s8 = sadd.s32 1, %s1407_s30  ;;  %s1411_s7 = sphi %s1481_s7, %s29_s7   ;;  %s1407_s30 = sphi %s1479_s30, %s2039_s30   ;;  %s1403_s29 = sphi %s1477_s29, %s2046_s29   ;;  %s1399_s28 = sphi %s1475_s28, %s2037_s28   ;;  %s1395_s27 = sphi %s1473_s27, %s2045_s27   ;;  %s1391_s26 = sphi %s1471_s26, %s2044_s26   ;;  %s1387_s25 = sphi %s1469_s25, %s2043_s25   ;;  %s1383_s24 = sphi %s1467_s24, %s2042_s24   ;;  %s1379_s23 = sphi %s1465_s23, %s2034_s23   ;;  %s1375_s22 = sphi %s1463_s22, %s2041_s22   ;;  %s1371_s21 = sphi %s1461_s21, %s2040_s21  }
  0x14   : > { %1978 = sst [smem:[#allocation22_spill]] %s1383_s24  ;;  %p1943_p0 = scmp.ne.s32.totalorder %s1391_s26, %s1387_s25 }
  0x15   : > { %1979 = sst [smem:[#allocation23_spill]] %s1391_s26  ;;  %p56_p1 = scmp.eq.s32.totalorder %s1411_s7, 0 }
  0x16   : > { %1980 = sst [smem:[#allocation24_spill]] %s1395_s27  ;;  %p1944_p2 = scmp.lt.s32.totalorder %s1411_s7, 8 }
  0x17   : > { %1981 = sst [smem:[#allocation25_spill]] %s1399_s28  ;;  %p57_p3 = por %p56_p1, %p1943_p0 }
  0x18   : > { %1982 = sst [smem:[#allocation26_spill]] %s1407_s30  ;;  %s1528_s10 = sand.u32 1, %s1391_s26  }
  0x19   : > { %1983 = sst [smem:[#allocation27_spill]] %s1411_s7  ;;  %s1942_s11 = sand.u32 1, %s1411_s7  }
  0x1a   : > { %p1533_p4 = pnand %p1944_p2, %p57_p3  ;;  %s885_s13 = sshll.u32 %s1407_s30, 4 }
  0x1b   : > { %s268_s14 = scalar_lea.vmem [#allocation6], %s1528_s10  ;;  %s1986_s1 = sld [smem:[#allocation37_spill]] }
  0x1c   : > { %s1984_s12 = scalar_select %p1533_p4, 1, 0 }
  0x1d   : > { %s275_s15 = sshll.u32 %s268_s14, 4  ;;  %s1548_s19 = scalar_lea.sflag [#allocation7], %s1942_s11  ;;  %s1544_s15 = int_to_ptr.vmem [resolvable:$true] %s275_s15 }
  0x1e   : > { %1985 = sst [smem:[#allocation28_spill]] %s1984_s12  ;;  %p1951_p6 = pneg %p1533_p4 }
  0x1f   : > { %1987 = sst [smem:[#allocation29_spill]] %s1548_s19 }
  0x21   : > { %s1542_s18 = scalar_lea.hbm %s1986_s1, %s885_s13  ;;  %s1100_s16 = scalar_lea.hbm %s1986_s1, 32 }
  0x22   : > { %s1095_s20 = scalar_lea.hbm %s1542_s18, 16  ;;  %p1101_p9 = scmp.lt.u32.totalorder %s1542_s18, %s1986_s1 }
  0x23   : > { %p1096_p5 = scmp.ne.s32.totalorder %s1542_s18, %s1095_s20  ;;  %p1102_p10 = scmp.lt.u32.totalorder %s1100_s16, %s1095_s20 }
  0x24   : > { %p1104_p12 = scmp.lt.u32.totalorder %s1095_s20, %s1542_s18 }
  0x25   : > { %p1098_p7 = pnand %p1951_p6, %p1096_p5  ;;  %p1103_p11 = por %p1102_p10, %p1101_p9 }
  0x27   : > { %p1099_p8 = pneg %p1098_p7  ;;  %p1105_p13 = por %p1104_p12, %p1103_p11 }
  0x29   : > { %p1106_p3 = pnand %p1105_p13, %p1099_p8 }
  0x2b   : > { %1109 = shalt.err (!%p1106_p3)
}
  0x2c   : > { %s1110_s11 = scalar_lea.vmem %s1544_s15, 16  ;;  %s1413_s14 = smov [#allocation6]  }
  0x2d   : > { %p1111_p5 = scmp.ne.s32.totalorder %s1544_s15, %s1110_s11  ;;  %s1115_s13 = sshll.u32 %s1413_s14, 4  ;;  %s1116_s13 = int_to_ptr.vmem [resolvable:$false] %s1115_s13 }
  0x2e   : > { %s1117_s9 = scalar_lea.vmem %s1116_s13, 32  ;;  %p1118_p2 = scmp.lt.s32.totalorder %s1544_s15, %s1116_s13 }
  0x2f   : > { %p1113_p7 = pnand %p1111_p5, %p1951_p6  ;;  %p1119_p9 = scmp.lt.s32.totalorder %s1117_s9, %s1110_s11 }
  0x31   : > { %p1114_p0 = pneg %p1113_p7  ;;  %p1120_p10 = por %p1119_p9, %p1118_p2 }
  0x33   : > { %p1121_p11 = pnand %p1120_p10, %p1114_p0 }
  0x35   : > { %1124 = shalt.err (!%p1121_p11)
}
  0x36   : > { %976 = dma.hbm_to_vmem [thread:$0]  (!%p1533_p4), %s1542_s18, 16, %s1544_s15, %s1548_s19  }
  0x37   : > { %s38_s11 = sadd.s32 1, %s1403_s29  ;;  %s100_s20 = sadd.s32 1, %s1379_s23 }
  0x38   : > { %p39_p0 = scmp.ge.s32.totalorder %s38_s11, 4  ;;  %p107_p2 = scmp.ne.s32.totalorder %s1379_s23, %s1375_s22 }
  0x39   : > { %s1581_s16 = sand.u32 1, %s1379_s23   ;;  %p1989_p3 = scmp.lt.s32.totalorder %s1411_s7, 8 }
  0x3a   : > { %s2048_s11 = smov (%p39_p0, %s38_s11), 0  ;;  %s2050_s8 = smov (!%p39_p0, %s41_s8), %s1407_s30 }
  0x3b   : > { %1988 = sst [smem:[#allocation30_spill]] %s2048_s11  ;;  %s97_s17 = ssub.s32 %s1403_s29, %s2048_s11 }
  0x3c   : > { %p109_p8 = por %p107_p2, %p56_p1  ;;  %p43_p12 = scmp.ge.s32.totalorder %s2050_s8, 2 }
  0x3d   : > { %p98_p13 = scmp.eq.s32.totalorder %s97_s17, 0  ;;  %s886_s15 = sshll.u32 %s1581_s16, 4 }
  0x3e   : > { %p1595_p5 = pnand %p1989_p3, %p109_p8  ;;  %s2052_s8 = smov (%p43_p12, %s2050_s8), 0 }
  0x3f   : > { %1991 = sst [smem:[#allocation31_spill]] %s2052_s8  ;;  %s45_s13 = ssub.s32 %s1407_s30, %s2052_s8 }
  0x40   : > { %s1990_s18 = scalar_select %p1595_p5, 1, 0 }
  0x41   : > { %s1602_s14 = scalar_select %p98_p13, %s1379_s23, %s100_s20  }
  0x42   : > { %p46_p7 = scmp.eq.s32.totalorder %s45_s13, 0  ;;  %s286_s9 = scalar_lea.vmem [#allocation8], %s886_s15 }
  0x43   : > { %1992 = sst [smem:[#allocation32_spill]] %s1602_s14  ;;  %s293_s1 = sshll.u32 %s286_s9, 4  ;;  %s1606_s1 = int_to_ptr.vmem [resolvable:$true] %s293_s1 }
  0x44   : > { %s1993_s17 = sadd.s32 1, %s1391_s26  ;;  %s889_s6 = sshll.u32 %s1403_s29, 4 }
  0x45   : > { %s1611_s11 = scalar_select %p46_p7, %s1391_s26, %s1993_s17  }
  0x46   : > { %s306_s28 = scalar_lea.vmem [#allocation9], %s1581_s16  ;;  %s1995_s3 = sld [smem:[#allocation38_spill]] }
  0x47   : > { %1994 = sst [smem:[#allocation33_spill]] %s1611_s11  ;;  %s313_s27 = sshll.u32 %s306_s28, 4  ;;  %s1620_s27 = int_to_ptr.vmem [resolvable:$true] %s313_s27 }
  0x48   : > { %s1996_s20 = sand.u32 1, %s1411_s7   ;;  %p1630_p9 = pneg %p1595_p5 }
  0x49   : > { %s1624_s15 = scalar_lea.sflag [#allocation10], %s1996_s20 }
  0x4c   : > { %s1618_s12 = scalar_lea.hbm %s1995_s3, %s889_s6  ;;  %s1130_s28 = scalar_lea.hbm %s1995_s3, 64 }
  0x4d   : > { %s1125_s13 = scalar_lea.hbm %s1618_s12, 16  ;;  %p1131_p0 = scmp.lt.u32.totalorder %s1618_s12, %s1995_s3 }
  0x4e   : > { %p1126_p1 = scmp.ne.s32.totalorder %s1618_s12, %s1125_s13  ;;  %p1132_p2 = scmp.lt.u32.totalorder %s1130_s28, %s1125_s13 }
  0x4f   : > { %p1134_p12 = scmp.lt.u32.totalorder %s1125_s13, %s1618_s12 }
  0x50   : > { %p1128_p10 = pnand %p1630_p9, %p1126_p1  ;;  %p1133_p8 = por %p1132_p2, %p1131_p0 }
  0x52   : > { %p1129_p11 = pneg %p1128_p10  ;;  %p1135_p13 = por %p1134_p12, %p1133_p8 }
  0x54   : > { %p1136_p3 = pnand %p1135_p13, %p1129_p11 }
  0x56   : > { %1139 = shalt.err (!%p1136_p3)
}
  0x57   : > { %s1140_s20 = scalar_lea.vmem %s1620_s27, 16  ;;  %s1414_s4 = smov [#allocation9]  }
  0x58   : > { %p1141_p7 = scmp.ne.s32.totalorder %s1620_s27, %s1140_s20  ;;  %s1145_s6 = sshll.u32 %s1414_s4, 4  ;;  %s1146_s6 = int_to_ptr.vmem [resolvable:$false] %s1145_s6 }
  0x59   : > { %s1147_s19 = scalar_lea.vmem %s1146_s6, 32  ;;  %p1148_p6 = scmp.lt.s32.totalorder %s1620_s27, %s1146_s6 }
  0x5a   : > { %p1143_p1 = pnand %p1141_p7, %p1630_p9  ;;  %p1149_p4 = scmp.lt.s32.totalorder %s1147_s19, %s1140_s20 }
  0x5c   : > { %p1144_p10 = pneg %p1143_p1  ;;  %p1150_p0 = por %p1149_p4, %p1148_p6 }
  0x5e   : > { %p1151_p2 = pnand %p1150_p0, %p1144_p10 }
  0x60   : > { %1154 = shalt.err (!%p1151_p2)
}
  0x61   : > { %982 = dma.hbm_to_vmem [thread:$0]  (!%p1595_p5), %s1618_s12, 16, %s1620_s27, %s1624_s15  }
  0x62   : > { %s1655_s13 = sadd.s32 4294967295, %s1411_s7   ;;  %s879_s28 = sadd.s32 4294967294, %s1411_s7  }
  0x63   : > { %p61_p4 = scmp.ne.s32.totalorder %s1387_s25, %s1383_s24  ;;  %p1967_p6 = scmp.eq.s32.totalorder %s1655_s13, 0 }
  0x64   : > { %p113_p11 = scmp.ne.s32.totalorder %s1375_s22, %s1371_s21  ;;  %p210_p8 = scmp.eq.s32.totalorder %s1655_s13, 7 }
  0x65   : > { %p1666_p12 = por %p1967_p6, %p61_p4  ;;  %p216_p13 = scmp.eq.s32.totalorder %s879_s28, 7 }
  0x66   : > { %p1672_p3 = por %p113_p11, %p1967_p6  ;;  %p2001_p7 = scmp.ne.s32.totalorder %s1391_s26, %s1387_s25 }
  0x67   : > { %s1998_s17 = scalar_select %p1666_p12, 1, 0 }
  0x68   : > { %s1999_s27 = scalar_select %p1672_p3, 1, 0 }
  0x69   : > { %p1679_p1 = por %p210_p8, %p2001_p7  ;;  %p1683_p10 = por %p216_p13, %p61_p4 }
  0x6a   : > { %2000 = sst [smem:[#allocation34_spill]] %s1999_s27  ;;  %p880_p0 = scmp.ge.s32.totalorder %s1411_s7, 1 }
  0x6b   : > { %s2002_s12 = scalar_select %p1679_p1, 1, 0 }
  0x6c   : > { %s2004_s21 = scalar_select %p1683_p10, 1, 0 }
  0x6d   : > { %2003 = sst [smem:[#allocation35_spill]] %s2002_s12  ;;  %p223_p2 = scmp.lt.s32.totalorder %s1411_s7, 9 }
  0x6e   : > { %2005 = sst [smem:[#allocation36_spill]] %s2004_s21  ;;  %s1415_s4 = smov [#allocation12]  }
  0x6f   : > { %p1689_p12 = pnand %p880_p0, %p223_p2  ;;  %s236_s6 = sshll.u32 %s1415_s4, 4  ;;  %s1693_s6 = int_to_ptr.vmem [resolvable:$true] %s236_s6 }
  0x70   : > { %s883_s19 = sshll.u32 %s1528_s10, 2  ;;  %s884_s28 = sshll.u32 %s1407_s30, 6 }
  0x71   : > { %s2006_s20 = scalar_select %p1689_p12, 1, 0 }
  0x72   : > { %p966_p11 = pneg %p1689_p12  ;;  %s251_s3 = scalar_lea.vmem [#allocation3], %s883_s19 }
  0x73   : > { %s258_s8 = sshll.u32 %s251_s3, 4  ;;  %s1708_s23 = scalar_lea.hbm %s1935_s0, %s884_s28  ;;  %s1710_s8 = int_to_ptr.vmem [resolvable:$true] %s258_s8 }
  0x74   : > { %p1701_p4 = pnand %p966_p11, %p1967_p6  ;;  %s914_s4 = sshll.u32 %s1403_s29, 8 }
  0x75   : > { %s1716_s30 = scalar_lea.hbm %s1937_s2, %s914_s4  ;;  %s1155_s7 = scalar_lea.hbm %s1940_s5, 16 }
  0x76   : > { %p1156_p8 = scmp.ne.s32.totalorder %s1940_s5, %s1155_s7  ;;  %p1157_p13 = pneg %p1701_p4 }
  0x77   : > { %p1162_p2 = scmp.lt.u32.totalorder %s1155_s7, %s1940_s5 }
  0x78   : > { %p1158_p7 = pnand %p1157_p13, %p1156_p8 }
  0x7a   : > { %p1159_p0 = pneg %p1158_p7 }
  0x7c   : > { %p1164_p11 = pnand %p1162_p2, %p1159_p0 }
  0x7e   : > { %1167 = shalt.err (!%p1164_p11)
}
  0x7f   : > { %s1168_s24 = scalar_lea.vmem %s1693_s6, 16  ;;  %s1175_s27 = scalar_lea.vmem %s1693_s6, 32 }
  0x80   : > { %p1169_p6 = scmp.ne.s32.totalorder %s1693_s6, %s1168_s24  ;;  %p1176_p3 = scmp.lt.s32.totalorder %s1693_s6, %s1693_s6 }
  0x81   : > { %p1177_p12 = scmp.lt.s32.totalorder %s1175_s27, %s1168_s24 }
  0x82   : > { %p1171_p10 = pnand %p1169_p6, %p1157_p13 }
  0x83   : > { %p1178_p8 = por %p1177_p12, %p1176_p3 }
  0x84   : > { %p1172_p1 = pneg %p1171_p10 }
  0x86   : > { %p1179_p7 = pnand %p1178_p8, %p1172_p1 }
  0x88   : > { %1182 = shalt.err (!%p1179_p7)
}
  0x89   : > { %s2008_s21 = sld [smem:[#allocation28_spill]]  ;;  %s248_s28 = scalar_lea.sflag [#allocation4], %s1528_s10 }
  0x8a   : > { %969 = dma.hbm_to_vmem [thread:$0]  (!%p1701_p4), %s1940_s5, 16, %s1693_s6, [#allocation13]  }
  0x8b   : > { %s1183_s4 = scalar_lea.hbm %s1708_s23, 64  ;;  %s1188_s19 = scalar_lea.hbm %s1935_s0, 128 }
  0x8c   : > { %p1184_p6 = scmp.ne.s32.totalorder %s1708_s23, %s1183_s4  ;;  %p1189_p13 = scmp.lt.u32.totalorder %s1708_s23, %s1935_s0 }
  0x8d   : > { %p1190_p0 = scmp.lt.u32.totalorder %s1188_s19, %s1183_s4  ;;  %p1192_p11 = scmp.lt.u32.totalorder %s1183_s4, %s1708_s23 }
  0x8f   : > { %p2009_p10 = scmp.ne.s32.totalorder %s2008_s21, 0  ;;  %p1191_p2 = por %p1190_p0, %p1189_p13 }
  0x91   : > { %p2010_p12 = pneg %p2009_p10  ;;  %p1193_p8 = por %p1192_p11, %p1191_p2 }
  0x93   : > { %p1186_p3 = pnand %p1184_p6, %p2010_p12 }
  0x95   : > { %p1187_p1 = pneg %p1186_p3 }
  0x97   : > { %p1194_p4 = pnand %p1193_p8, %p1187_p1 }
  0x99   : > { %1197 = shalt.err (!%p1194_p4)
}
  0x9a   : > { %s1198_s10 = scalar_lea.vmem %s1710_s8, 64  ;;  %p2011_p6 = pmov %p2010_p12 }
  0x9b   : > { %p1199_p7 = scmp.ne.s32.totalorder %s1710_s8, %s1198_s10  ;;  %s1416_s6 = smov [#allocation3]  }
  0x9c   : > { %s1203_s24 = sshll.u32 %s1416_s6, 4  ;;  %s1204_s24 = int_to_ptr.vmem [resolvable:$false] %s1203_s24 }
  0x9d   : > { %p1201_p12 = pnand %p1199_p7, %p2011_p6  ;;  %s1205_s27 = scalar_lea.vmem %s1204_s24, 128 }
  0x9e   : > { %p1206_p5 = scmp.lt.s32.totalorder %s1710_s8, %s1204_s24  ;;  %p1207_p13 = scmp.lt.s32.totalorder %s1205_s27, %s1198_s10 }
  0x9f   : > { %p1202_p3 = pneg %p1201_p12 }
  0xa0   : > { %p1208_p0 = por %p1207_p13, %p1206_p5 }
  0xa2   : > { %p1209_p2 = pnand %p1208_p0, %p1202_p3 }
  0xa4   : > { %1212 = shalt.err (!%p1209_p2)
}
  0xa5   : > { %973 = dma.hbm_to_vmem [thread:$0]  (!%p2009_p10), %s1708_s23, 64, %s1710_s8, %s248_s28  }
  0xa6   : > { %s1213_s7 = scalar_lea.hbm %s1716_s30, 256  ;;  %s1218_s3 = scalar_lea.hbm %s1937_s2, 1024 }
  0xa7   : > { %p1214_p1 = scmp.ne.s32.totalorder %s1716_s30, %s1213_s7  ;;  %p1219_p5 = scmp.lt.u32.totalorder %s1716_s30, %s1937_s2 }
  0xa8   : > { %p1220_p4 = scmp.lt.u32.totalorder %s1218_s3, %s1213_s7  ;;  %p1222_p6 = scmp.lt.u32.totalorder %s1213_s7, %s1716_s30 }
  0xa9   : > { %p1216_p11 = pnand %p1214_p1, %p1630_p9 }
  0xaa   : > { %p1221_p7 = por %p1220_p4, %p1219_p5 }
  0xab   : > { %p1217_p8 = pneg %p1216_p11 }
  0xac   : > { %p1223_p12 = por %p1222_p6, %p1221_p7 }
  0xae   : > { %p1224_p3 = pnand %p1223_p12, %p1217_p8 }
  0xb0   : > { %1227 = shalt.err (!%p1224_p3)
}
  0xb1   : > { %s1228_s23 = scalar_lea.vmem %s1606_s1, 256  ;;  %s1417_s8 = smov [#allocation8]  }
  0xb2   : > { %p1229_p10 = scmp.ne.s32.totalorder %s1606_s1, %s1228_s23  ;;  %s1233_s21 = sshll.u32 %s1417_s8, 4  ;;  %s1234_s21 = int_to_ptr.vmem [resolvable:$false] %s1233_s21 }
  0xb3   : > { %s1235_s28 = scalar_lea.vmem %s1234_s21, 512  ;;  %p1236_p2 = scmp.lt.s32.totalorder %s1606_s1, %s1234_s21 }
  0xb4   : > { %p1231_p13 = pnand %p1229_p10, %p1630_p9  ;;  %p1237_p1 = scmp.lt.s32.totalorder %s1235_s28, %s1228_s23 }
  0xb6   : > { %p1232_p0 = pneg %p1231_p13  ;;  %p1238_p11 = por %p1237_p1, %p1236_p2 }
  0xb8   : > { %p1239_p5 = pnand %p1238_p11, %p1232_p0 }
  0xba   : > { %1242 = shalt.err (!%p1239_p5)
}
  0xbb   : > { %s1418_s26 = smov 64   ;;  %s2012_s14 = sld [smem:[#allocation29_spill]] }
  0xbc   : > { %s1419_s10 = smov 4   ;;  %p2013_p8 = scmp.ne.s32.totalorder %s1990_s18, 0 }
  0xbd   : > { %s890_s6 = sshll.u32 %s1581_s16, 2  ;;  %s891_s24 = sshll.u32 %s1403_s29, 6 }
  0xbe   : > { %s2014_s12 = sld [smem:[#allocation39_spill]]  ;;  %s324_s3 = scalar_lea.vmem [#allocation11], %s890_s6 }
  0xbf   : > { %s331_s11 = sshll.u32 %s324_s3, 4  ;;  %s332_s11 = int_to_ptr.vmem [resolvable:$true] %s331_s11 }
  0xc1   : > { %979 = dma.hbm_to_vmem [thread:$0]  (!%p2013_p8), %s1716_s30, 256, %s1606_s1, %s2012_s14, %s1418_s26, %s1418_s26, %s1419_s10  }
  0xc4   : > { %s1791_s4 = scalar_lea.hbm %s2014_s12, %s891_s24  ;;  %s1248_s16 = scalar_lea.hbm %s2014_s12, 256 }
  0xc5   : > { %s1243_s19 = scalar_lea.hbm %s1791_s4, 64  ;;  %p1249_p12 = scmp.lt.u32.totalorder %s1791_s4, %s2014_s12 }
  0xc6   : > { %p1244_p4 = scmp.ne.s32.totalorder %s1791_s4, %s1243_s19  ;;  %p1250_p3 = scmp.lt.u32.totalorder %s1248_s16, %s1243_s19 }
  0xc7   : > { %p1252_p13 = scmp.lt.u32.totalorder %s1243_s19, %s1791_s4 }
  0xc8   : > { %p1246_p7 = pnand %p1244_p4, %p1630_p9  ;;  %p1251_p10 = por %p1250_p3, %p1249_p12 }
  0xca   : > { %p1247_p6 = pneg %p1246_p7  ;;  %p1253_p0 = por %p1252_p13, %p1251_p10 }
  0xcc   : > { %p1254_p2 = pnand %p1253_p0, %p1247_p6 }
  0xce   : > { %1257 = shalt.err (!%p1254_p2)
}
  0xcf   : > { %s1258_s21 = scalar_lea.vmem %s332_s11, 64  ;;  %s1420_s28 = smov [#allocation11]  }
  0xd0   : > { %p1259_p1 = scmp.ne.s32.totalorder %s332_s11, %s1258_s21  ;;  %s1263_s26 = sshll.u32 %s1420_s28, 4  ;;  %s1264_s26 = int_to_ptr.vmem [resolvable:$false] %s1263_s26 }
  0xd1   : > { %s1265_s14 = scalar_lea.vmem %s1264_s26, 128  ;;  %p1266_p4 = scmp.lt.s32.totalorder %s332_s11, %s1264_s26 }
  0xd2   : > { %p1261_p11 = pnand %p1259_p1, %p1630_p9  ;;  %p1267_p7 = scmp.lt.s32.totalorder %s1265_s14, %s1258_s21 }
  0xd4   : > { %p1262_p5 = pneg %p1261_p11  ;;  %p1268_p8 = por %p1267_p7, %p1266_p4 }
  0xd6   : > { %p1269_p3 = pnand %p1268_p8, %p1262_p5 }
  0xd8   : > { %1272 = shalt.err (!%p1269_p3)
}
  0xd9   : > { %p2015_p12 = scmp.ne.s32.totalorder %s1990_s18, 0  ;;  %p2016_p6 = scmp.ne.s32.totalorder %s2006_s20, 0 }
  0xda   : > { %s1814_s9 = sand.u32 (!%p2016_p6), 1, %s1387_s25   ;;  %p2017_p9 = scmp.ne.s32.totalorder (!%p2016_p6), %s1998_s17, 0 }
  0xdb   : > { %985 = dma.hbm_to_vmem [thread:$0]  (!%p2015_p12), %s1791_s4, 64, %s332_s11, %s1624_s15  }
  0xdc   : > { %340 = sbr.rel (%p2016_p6) target bundleno = 1610 (0x64a), region = 44  ;;  %s893_s10 = sshll.u32 (!%p2016_p6), %s1814_s9, 2 }
  0xdd   : > { %s343_s6 = scalar_lea.sflag (!%p2016_p6), [#allocation4], %s1814_s9  ;;  %s1818_s24 = scalar_lea.vmem (!%p2016_p6), [#allocation3], %s893_s10 }
  0xe3   : > { %1346 = dma.done.wait (%p2017_p9), %s343_s6, 64  }
  0xe4   : > { %1348 = vsyncadd (%p2017_p9), %s343_s6, 4294967232  ;;  %s351_s18 = sand.u32 1, %s1655_s13   ;;  %s354_s20 = scalar_lea.vmem [#allocation6], %s1814_s9 }
  0xe5   : > { %s352_s15 = scalar_lea.sflag [#allocation7], %s351_s18 }
  0xe6   : > { %1350 = dma.done.wait (%p2017_p9), %s352_s15, 16  }
  0xe7   : > { %1352 = vsyncadd (%p2017_p9), %s352_s15, 4294967280  ;;  %s2018_s27 = sld [smem:[#allocation34_spill]]  ;;  %s1831_s7 = sand.u32 1, %s1375_s22  }
  0xe8   : > { %s894_s4 = sshll.u32 %s1831_s7, 4 }
  0xe9   : > { %s363_s3 = scalar_lea.vmem [#allocation8], %s894_s4 }
  0xed   : > { %p2019_p8 = scmp.ne.s32.totalorder %s2018_s27, 0 }
  0xef   : > { %1354 = dma.done.wait (%p2019_p8), %s352_s15, 256  }
  0xf0   : > { %1356 = vsyncadd (%p2019_p8), %s352_s15, 4294967040  ;;  %s369_s11 = scalar_lea.sflag [#allocation10], %s351_s18  ;;  %s371_s19 = scalar_lea.vmem [#allocation9], %s1831_s7 }
  0xf1   : > { %1358 = dma.done.wait (%p2019_p8), %s369_s11, 80  }
  0xf2   : > { %1360 = vsyncadd (%p2019_p8), %s369_s11, 4294967216  ;;  %s895_s17 = sshll.u32 %s1831_s7, 2  ;;  %p2020_p10 = scmp.eq.s32.totalorder %s1655_s13, 0 }
  0xf3   : > { %s1844_s1 = scalar_lea.vmem [#allocation11], %s895_s17 }
  0xf4   : > { %1362 = dma.done.wait (%p2020_p10), [#allocation13], 16   ;;  %p2021_p13 = pmov %p2020_p10 }
  0xf5   : > { %s897_s30 = sshll.u32 %s1814_s9, 3  ;;  %v1421_v0 = vmov 0.0   ;;  %vm1422_vm0 = vmmov 0   ;;  %v1089_v1 = vld [vmem:[%s363_s3] sm:$0xff]   ;;  %v1090_v2 = vld [vmem:[%s363_s3 + $0x8] sm:$0xff]   ;;  %vm456_vm1 = vcmask 261120  }
  0xf6   : > { %1364 = vsyncadd (%p2021_p13), [#allocation13], 4294967280  ;;  %924 = vmatprep.subr.bf16.mxu0 %v1421_v0  ;;  %928 = vmatprep.mubr.msk.bf16.mxu0 %vm1422_vm0, %v1421_v0  ;;  %v432_v3 = vld [vmem:[%s1818_s24] sm:$0xf]  ;;  %v898_v4 = vld [vmem:[%s371_s19] ss:$0 sm:$0xff] }
  0xf7   : > { %932 = vmatprep.subr.bf16.mxu1 %v1421_v0  ;;  %934 = vmatprep.mubr.msk.bf16.mxu1 %vm1422_vm0, %v1421_v0  ;;  %s1423_s13 = smov 120   ;;  %vm511_vm2 = vcmask 64512   ;;  %v902_v13 = vld [vmem:[%s354_s20] ss:$0 sm:$0xff]  ;;  %s1424_s16 = smov 112   ;;  %vm575_vm3 = vcmask 1043456  }
  0xf8   : > { %925 = vmatpush3.bf16.msra.mxu0 %v1089_v1  ;;  %v620_v25 = vld [vmem:[%s1844_s1] sm:$0xf]  ;;  %s430_s23 = scalar_lea.vmem [#allocation14], %s897_s30  ;;  %s2022_s8 = sld [smem:[#allocation24_spill]] }
  0xf9   : > { %926 = vmatprep.subr.bf16.mxu0 %v1421_v0  ;;  %v625_v26 = vsel %vm575_vm3, %v620_v25, 0 }
  0xfc   : > { %927 = vmatpush3.bf16.msra.mxu0 %v1090_v2 }
  0xfd   : > { %938 = vmatprep.subr.bf16.mxu0 %v1421_v0 }
  0xfe   : > { %p906_p0 = scmp.ne.s32.totalorder %s2022_s8, 0 }
  0xff   : > { %929 = vmatmul.mubr.msk.bf16.vlgmr.msra.gmra.mrb[0].mxu0 %vm456_vm1, %v432_v3  ;;  %v907_v42 = vld [vmem:[#allocation12] ss:$0 sm:$0xff] (!%p906_p0) }
 0x100   : > { %940 = vmatprep.mubr.msk.bf16.mxu0 %vm1422_vm0, %v1421_v0 }
 0x1d2   : > { %v494_v5 = vpop.f32.mrb[0].mxu0 }
 0x1d3   : > { %v495_v6 = vadd.f32 %v898_v4, %v494_v5  ;;  %v930_v7 = vpop.f32.mrb[1].mxu0 }
 0x1d4   : > { %v497_v8 = vpop.f32.mrb[2].mxu0 }
 0x1d5   : > { %v500_v9 = vpack.c.bf16 %v495_v6, %v495_v6  ;;  %v931_v10 = vpop.f32.mrb[3].mxu0 }
 0x1d7   : > { %509 = vrot.lane.b32.xlu0 %v500_v9, %s1423_s13 }
 0x249   : > { %v510_v11 = vpop.permute.xlu0 %509 }
 0x24a   : > { %v516_v12 = vsel %vm511_vm2, %v510_v11, 0 }
 0x24b   : > { %933 = vmatpush3.bf16.xpose.msra.mxu1 %v516_v12 }
 0x24c   : > { %944 = vmatprep.subr.bf16.mxu1 %v1421_v0 }
 0x252   : > { %935 = vmatmul.mubr.msk.bf16.vlgmr.msra.gmra.mrb[0].mxu1 %vm511_vm2, %v500_v9 }
 0x253   : > { %946 = vmatprep.mubr.msk.bf16.mxu1 %vm1422_vm0, %v1421_v0  ;;  %945 = vmatpush3.bf16.msra.mxu1 %v625_v26 }
 0x325   : > { %v552_v14 = vpop.f32.mrb[0].mxu1 }
 0x326   : > { %v553_v15 = vadd.f32 %v902_v13, %v552_v14  ;;  %v936_v16 = vpop.f32.mrb[1].mxu1 }
 0x327   : > { %v555_v17 = vpop.f32.mrb[2].mxu1 }
 0x328   : > { %v937_v18 = vpop.f32.mrb[3].mxu1  ;;  %v558_v19 = vsel %vm511_vm2, %v553_v15, -inf }
 0x329   : > { %559 = vmax.xlane.f32.xlu0 %v558_v19 }
 0x3b6   : > { %v560_v20 = vpop.xlane.xlu0 %559 }
 0x3b7   : > { %v561_v21 = vsub.f32 %v553_v15, %v560_v20 }
 0x3b9   : > { %v562_v22 = vmul.f32 1.442695, %v561_v21 }
 0x3bb   : > { %1091 = vpow2.f32 %v562_v22 }
 0x3c5   : > { %v1092_v23 = vpop.eup %1091 }
 0x3c6   : > { %v564_v24 = vsel %vm511_vm2, %v1092_v23, 0.0 }
 0x3c7   : > { %565 = vadd.xlane.f32.xlu1 %v564_v24 }
 0x3d8   : > { %570 = vrot.lane.b32.xlu1 %v500_v9, %s1424_s16 }
 0x454   : > { %v566_v27 = vpop.xlane.xlu1 %565 }
 0x455   : > { %1093 = vrcp.f32 %v566_v27 }
 0x458   : > { %v571_v28 = vpop.permute.xlu1 %570 }
 0x459   : > { %v577_v29 = vsel %vm575_vm3, %v571_v28, 0 }
 0x45a   : > { %939 = vmatpush3.bf16.msra.mxu0 %v577_v29 }
 0x45f   : > { %v1094_v30 = vpop.eup %1093 }
 0x460   : > { %v568_v31 = vmul.f32 %v1094_v30, %v1092_v23 }
 0x462   : > { %v569_v32 = vpack.c.bf16 %v568_v31, %v568_v31 }
 0x464   : > { %941 = vmatmul.mubr.msk.bf16.vlgmr.msra.gmra.mrb[4].mxu0 %vm511_vm2, %v569_v32 }
 0x537   : > { %v613_v33 = vpop.f32.mrb[4].mxu0 }
 0x538   : > { %v619_v34 = vpack.c.bf16 %v613_v33, %v613_v33  ;;  %v942_v35 = vpop.f32.mrb[5].mxu0 }
 0x539   : > { %v616_v36 = vpop.f32.mrb[6].mxu0 }
 0x53a   : > { %v943_v37 = vpop.f32.mrb[7].mxu0  ;;  %947 = vmatmul.mubr.msk.bf16.vlgmr.msra.gmra.mrb[4].mxu1 %vm511_vm2, %v619_v34 }
 0x60a   : > { %670 = sbr.rel (%p906_p0) target bundleno = 1553 (0x611), region = 72 }
 0x60d   : > { %v661_v38 = vpop.f32.mrb[4].mxu1 }
 0x60e   : > { %v948_v39 = vpop.f32.mrb[5].mxu1  ;;  %v678_v43 = vadd.f32 (!%p906_p0), %v907_v42, %v661_v38 }
 0x60f   : > { %v664_v40 = vpop.f32.mrb[6].mxu1 }
 0x610   : > { %v949_v41 = vpop.f32.mrb[7].mxu1  ;;  %679 = vst.msk [vmem:[#allocation2] sm:$0xff] (!%p906_p0), %vm456_vm1, %v678_v43 }
 0x611 PF: > { %s2023_s21 = sld [smem:[#allocation24_spill]] }
 0x617   : > { %p908_p2 = scmp.eq.s32.totalorder %s2023_s21, 0 }
 0x618   : > { %v684_v44 = vld [vmem:[#allocation2] sm:$0xff] (!%p908_p2) }
 0x619   : > { %683 = sbr.rel (%p908_p2) target bundleno = 1568 (0x620), region = 76  ;;  %v685_v45 = vadd.f32 (!%p908_p2), %v684_v44, %v661_v38 }
 0x61b   : > { %686 = vst.msk [vmem:[#allocation2] sm:$0xff] (!%p908_p2), %vm456_vm1, %v685_v45 }
 0x620 PF: > { %s2024_s28 = sld [smem:[#allocation24_spill]] }
 0x626   : > { %p909_p1 = scmp.ne.s32.totalorder %s2024_s28, 3 }
 0x627   : > { %v691_v46 = vld [vmem:[#allocation2] sm:$0xff] (!%p909_p1) }
 0x628   : > { %690 = sbr.rel (%p909_p1) target bundleno = 1583 (0x62f), region = 80  ;;  %692 = vst.msk [vmem:[%s430_s23] sm:$0xff] (!%p909_p1), %vm456_vm1, %v691_v46 }
 0x62f PF: > { %s2025_s26 = sld [smem:[#allocation25_spill]]  ;;  %s2026_s14 = sld [smem:[#allocation35_spill]] }
 0x630   : > { %s2027_s18 = sld [smem:[#allocation40_spill]]  ;;  %s707_s20 = sshll.u32 %s430_s23, 4  ;;  %s708_s20 = int_to_ptr.vmem [resolvable:$true] %s707_s20 }
 0x631   : > { %s694_s27 = scalar_lea.sflag [#allocation5], %s1814_s9  ;;  %s1273_s7 = scalar_lea.vmem %s708_s20, 128 }
 0x632   : > { %p1274_p11 = scmp.ne.s32.totalorder %s708_s20, %s1273_s7  ;;  %s1425_s4 = smov [#allocation14]  }
 0x633   : > { %s1277_s3 = sshll.u32 %s1425_s4, 4  ;;  %s1278_s3 = int_to_ptr.vmem [resolvable:$false] %s1277_s3 }
 0x634   : > { %s1279_s11 = scalar_lea.vmem %s1278_s3, 256  ;;  %p1280_p3 = scmp.lt.s32.totalorder %s708_s20, %s1278_s3 }
 0x635   : > { %s911_s10 = sshll.u32 %s2025_s26, 7  ;;  %p2028_p5 = scmp.ne.s32.totalorder %s2026_s14, 0 }
 0x636   : > { %s1878_s15 = scalar_lea.hbm %s2027_s18, %s911_s10  ;;  %p1281_p12 = scmp.lt.s32.totalorder %s1279_s11, %s1273_s7 }
 0x637   : > { %p1275_p4 = pnand %p1274_p11, %p2028_p5 }
 0x638   : > { %p1282_p6 = por %p1281_p12, %p1280_p3 }
 0x639   : > { %p1276_p7 = pneg %p1275_p4 }
 0x63b   : > { %p1283_p9 = pnand %p1282_p6, %p1276_p7 }
 0x63d   : > { %1286 = shalt.err (!%p1283_p9)
}
 0x63e   : > { %s1287_s9 = scalar_lea.hbm %s1878_s15, 128  ;;  %s1291_s1 = scalar_lea.hbm %s2027_s18, 256 }
 0x63f   : > { %p1288_p8 = scmp.ne.s32.totalorder %s1878_s15, %s1287_s9  ;;  %p1292_p0 = scmp.lt.u32.totalorder %s1878_s15, %s2027_s18 }
 0x640   : > { %p1293_p2 = scmp.lt.u32.totalorder %s1291_s1, %s1287_s9  ;;  %p1295_p11 = scmp.lt.u32.totalorder %s1287_s9, %s1878_s15 }
 0x641   : > { %p1289_p10 = pnand %p1288_p8, %p2028_p5 }
 0x642   : > { %p1294_p1 = por %p1293_p2, %p1292_p0 }
 0x643   : > { %p1290_p13 = pneg %p1289_p10 }
 0x644   : > { %p1296_p4 = por %p1295_p11, %p1294_p1 }
 0x646   : > { %p1297_p7 = pnand %p1296_p4, %p1290_p13 }
 0x648   : > { %1300 = shalt.err (!%p1297_p7)
}
 0x649   : > { %964 = dma.vmem_to_hbm [thread:$0]  (%p2028_p5), %s708_s20, 128, %s1878_s15, %s694_s27  }
 0x64a PF: > { %s2029_s16 = sld [smem:[#allocation27_spill]]  ;;  %s2030_s23 = sld [smem:[#allocation22_spill]] }
 0x64b   : > { %s2031_s8 = sld [smem:[#allocation36_spill]] }
 0x650   : > { %p993_p3 = scmp.ge.s32.totalorder %s2029_s16, 2  ;;  %s719_s21 = sand.u32 1, %s2030_s23  }
 0x651   : > { %p2032_p12 = scmp.ne.s32.totalorder %s2031_s8, 0  ;;  %s720_s28 = scalar_lea.sflag [#allocation5], %s719_s21 }
 0x653   : > { %p987_p6 = pnand %p993_p3, %p2032_p12 }
 0x655   : > { %1366 = dma.done.wait (!%p987_p6), %s720_s28, 128  }
 0x656   : > { %1368 = vsyncadd (!%p987_p6), %s720_s28, 4294967168  ;;  %s29_s7 = sadd.s32 1, %s2029_s16   ;;  %s2033_s26 = sld [smem:[#allocation21_spill]] }
 0x657   : > { %p26_p9 = scmp.ge.s32.totalorder %s29_s7, 10   ;;  %s2034_s23 = sld [smem:[#allocation32_spill]] }
 0x658   : > { %s2035_s14 = sld [smem:[#allocation23_spill]]  ;;  %s2036_s10 = sld [smem:[#allocation33_spill]] }
 0x659   : > { %s2037_s28 = sld [smem:[#allocation26_spill]]  ;;  %s2038_s6 = sld [smem:[#allocation30_spill]] }
 0x65a   : > { %s2039_s30 = sld [smem:[#allocation31_spill]]  ;;  %s2040_s21 = smov %s1375_s22 }
 0x65b   : > { %s2042_s24 = smov %s1387_s25  ;;  %s2045_s27 = smov %s1403_s29 }
 0x65c   : > { %s2041_s22 = smov %s2033_s26  ;;  %28 = sbr.rel (!%p26_p9) target bundleno = 19 (0x13), region = 153 }
 0x65e   : > { %s2043_s25 = smov %s2035_s14  ;;  %s2044_s26 = smov %s2036_s10 }
 0x65f   : > { %s2046_s29 = smov %s2038_s6 }
 0x663   :  { %725 = vsyncpa [#allocation4], 1 }
 0x664   :  { %727 = vsyncpa [#allocation4 + $0x1], 1 }
 0x665   :  { %728 = vsyncpa [#allocation7], 1 }
 0x666   :  { %730 = vsyncpa [#allocation7 + $0x1], 1 }
 0x667   :  { %731 = vsyncpa [#allocation10], 1 }
 0x668   :  { %733 = vsyncpa [#allocation10 + $0x1], 1 }
 0x669   :  { %734 = vsyncpa [#allocation13], 1 }
 0x66a   :  { %735 = vsyncpa [#allocation5], 1 }
 0x66b   :  { %737 = vsyncpa [#allocation5 + $0x1], 1 }

</bundles_post_ra>
